<compile_context>
chip_gen: v7x
topology: tpu7x:2x2x1
jax: 0.10.0
libtpu: 0.0.40
codegen_flags: <defaults>
</compile_context>

<pallas_src>
import functools

import jax
import jax.numpy as jnp
from jax.experimental import pallas as pl
from jax.experimental.pallas import tpu as pltpu


def _dice_partial_kernel(p_ref, t_ref, inter_ref, sums_ref, *,
                         rows_total: int, block_rows: int,
                         tiles_per_split: int, acc_rows: int):
    """Accumulate [intersection, sum(p)+sum(t)] vector partials for one split."""
    s = pl.program_id(0)          # parallel split index
    j = pl.program_id(1)          # sequential tile index within the split

    @pl.when(j == 0)
    def _init():
        inter_ref[...] = jnp.zeros_like(inter_ref)
        sums_ref[...] = jnp.zeros_like(sums_ref)

    # Native-dtype tiles, widened on the VPU.
    p = p_ref[...].astype(jnp.float32)
    t = t_ref[...].astype(jnp.float32)

    # Logical (unclamped) start row of this block; rem = number of valid rows.
    row0 = (s * tiles_per_split + j) * block_rows
    rem = rows_total - row0

    def _acc(prod, both):
        # (block_rows,128) -> (block_rows//acc_rows, acc_rows, 128), reduce the
        # leading dim: pure vreg adds into acc_rows//8 independent accumulator
        # vregs per output (no per-step cross-lane reduce, short dep chains).
        inter_ref[...] += prod.reshape(-1, acc_rows, 128).sum(axis=0)
        sums_ref[...] += both.reshape(-1, acc_rows, 128).sum(axis=0)

    @pl.when(rem >= block_rows)
    def _full_block():
        _acc(p * t, p + t)

    @pl.when(rem < block_rows)
    def _tail_block():
        # Partial / out-of-range block: mask rows beyond the valid range
        # (Pallas leaves the out-of-bounds region of the tile unspecified;
        #  jnp.where selects 0 even if that region holds NaN/Inf).
        rid = jax.lax.broadcasted_iota(jnp.int32, (block_rows, 128), 0)
        m = rid < rem
        _acc(jnp.where(m, p * t, 0.0), jnp.where(m, p + t, 0.0))


def _sublane_multiple(dtype) -> int:
    """Packed-sublane multiple for a dtype (8 for 32-bit, 16 bf16, 32 int8)."""
    itemsize = jnp.dtype(dtype).itemsize
    return max(8, 8 * (4 // max(1, itemsize)))


def _chip_defaults():
    """(block_rows, num_splits) defaults per TPU generation."""
    try:
        kind = jax.devices()[0].device_kind.lower()
    except Exception:  # pragma: no cover - defensive; assume generic TPU.
        kind = ""
    if "v7" in kind:
        # 2 TCs/chip, ~3.2 TB/s HBM: bigger tiles + one split per core.
        return 8192, 2
    return 4096, 1


def binary_dice_loss(predict, target, smooth: float = 1.0,
                     block_rows: int | None = None,
                     num_splits: int | None = None):
    """Pallas equivalent of BinaryDiceLoss.forward (returns a scalar)."""
    lane = 128
    p = jnp.reshape(predict, (-1,))
    t = jnp.reshape(target, (-1,))
    n = p.shape[0]
    if n == 0:
        # intersection = sums = 0  ->  dice = smooth / smooth = 1  ->  loss 0.
        return jnp.float32(0.0)

    def_br, def_splits = _chip_defaults()
    if block_rows is None:
        block_rows = def_br
    if num_splits is None:
        num_splits = def_splits

    rows = pl.cdiv(n, lane)
    pad = rows * lane - n
    if pad:
        # Only hit when numel % 128 != 0 (rare for segmentation shapes);
        # zero-pad is exact for both the product and the sums.
        p = jnp.pad(p, (0, pad))
        t = jnp.pad(t, (0, pad))
    p2 = p.reshape(rows, lane)
    t2 = t.reshape(rows, lane)

    # Tile rows: multiple of the packed-sublane size of the (native) dtypes,
    # capped to the rounded-up row count so small inputs stay small in VMEM.
    sub = max(_sublane_multiple(p2.dtype), _sublane_multiple(t2.dtype))
    br = max(sub, (int(block_rows) + sub - 1) // sub * sub)
    br = min(br, (rows + sub - 1) // sub * sub)

    # Number of resident accumulator rows (K independent (8,128) vreg partials).
    acc_rows = 32 if br % 32 == 0 else (16 if br % 16 == 0 else 8)

    tiles = pl.cdiv(rows, br)
    n_splits = max(1, min(int(num_splits), tiles))
    tps = pl.cdiv(tiles, n_splits)

    # If the split is uneven, the last split asks for block indices past the
    # end; clamp them (the in-kernel row mask zeroes their contribution).
    needs_clamp = n_splits * tps > tiles

    def in_map(s, j):
        idx = s * tps + j
        if needs_clamp:
            idx = jnp.minimum(idx, tiles - 1)
        return (idx, 0)

    kernel = functools.partial(
        _dice_partial_kernel,
        rows_total=rows, block_rows=br, tiles_per_split=tps, acc_rows=acc_rows)

    out_sds = jax.ShapeDtypeStruct((n_splits * acc_rows, lane), jnp.float32)
    out_spec = pl.BlockSpec((acc_rows, lane), lambda s, j: (s, 0))

    # Explicit scoped-VMEM limit with headroom: 2 inputs x 2 pipeline buffers
    # of the native-dtype tile (outputs/accumulators are tiny).
    itemsize = max(jnp.dtype(p2.dtype).itemsize, jnp.dtype(t2.dtype).itemsize)
    vmem_limit = max(2 * 2 * br * lane * itemsize + (4 << 20), 16 << 20)

    # TODO(synk): if an xprof profile on v7x shows only one TensorCore
    # streaming, switch the leading axis to pltpu.CORE_PARALLEL (or an
    # explicit pl.core_map) with n_splits = number of TCs.
    inter_part, sums_part = pl.pallas_call(
        kernel,
        out_shape=(out_sds, out_sds),
        grid_spec=pltpu.PrefetchScalarGridSpec(
            num_scalar_prefetch=0,
            grid=(n_splits, tps),
            in_specs=[
                pl.BlockSpec((br, lane), in_map),
                pl.BlockSpec((br, lane), in_map),
            ],
            out_specs=[out_spec, out_spec],
        ),
        compiler_params=pltpu.CompilerParams(
            dimension_semantics=("parallel", "arbitrary"),
            vmem_limit_bytes=int(vmem_limit)),
    )(p2, t2)

    # Tiny finalize in the wrapper (runs once; keeps the kernel pure streaming).
    intersection = jnp.sum(inter_part)
    psum_tsum = jnp.sum(sums_part)
    dice = (2.0 * intersection + smooth) / (psum_tsum + smooth)
    return 1.0 - dice


def binary_dice_loss_ref(predict, target, smooth: float = 1.0):
    p = jnp.reshape(predict, (-1,)).astype(jnp.float32)
    t = jnp.reshape(target, (-1,)).astype(jnp.float32)
    inter = jnp.sum(p * t)
    dice = (2.0 * inter + smooth) / (jnp.sum(p) + jnp.sum(t) + smooth)
    return 1.0 - dice


if __name__ == "__main__":
    key = jax.random.PRNGKey(0)

    # (shape, dtypes, kwargs): exercise the default path, ragged lanes /
    # partial tiles, the multi-split path, the uneven-split (clamped index)
    # path, and native narrow-dtype streaming (bf16 predictions, uint8 masks).
    cases = [
        ((2, 4, 16, 16), (jnp.float32, jnp.float32), {}),
        ((1, 1, 50, 50), (jnp.float32, jnp.float32), {}),      # numel % 128 != 0
        ((2, 4, 16, 16), (jnp.float32, jnp.float32),
         {"block_rows": 32, "num_splits": 2}),                  # 2 splits
        ((3, 1, 32, 32), (jnp.float32, jnp.float32),
         {"block_rows": 8, "num_splits": 2}),                   # uneven split
        ((2, 4, 16, 16), (jnp.bfloat16, jnp.uint8), {}),        # narrow dtypes
    ]

    for idx, (shape, (p_dt, t_dt), kwargs) in enumerate(cases):
        k1, k2, key = jax.random.split(jax.random.fold_in(key, idx), 3)
        predict = jax.nn.sigmoid(
            jax.random.normal(k1, shape, jnp.float32)).astype(p_dt)
        target = (jax.random.uniform(k2, shape) > 0.5).astype(t_dt)

        loss = binary_dice_loss(predict, target, smooth=1.0, **kwargs)
        loss = jax.block_until_ready(loss)
        ref = binary_dice_loss_ref(predict, target, smooth=1.0)
        assert jnp.allclose(loss, ref, rtol=1e-5, atol=1e-6), (shape, loss, ref)

    print("KERNEL_OK")
</pallas_src>

<mosaic_0001>
module attributes {stable_mosaic.version = 11 : i64} {
  func.func @_dice_partial_kernel(%arg0: i32, %arg1: i32, %arg2: memref<16x128xf32, #tpu.memory_space<vmem>>, %arg3: memref<16x128xf32, #tpu.memory_space<vmem>>, %arg4: memref<16x128xf32, #tpu.memory_space<vmem>>, %arg5: memref<16x128xf32, #tpu.memory_space<vmem>>) attributes {dimension_semantics = [#tpu.dimension_semantics<parallel>, #tpu.dimension_semantics<arbitrary>], iteration_bounds = array<i64: 1, 1>, scalar_prefetch = 0 : i64, scratch_operands = 0 : i64, tpu.core_type = #tpu.core_type<tc>, window_params = [{transform_indices = @transform_0, window_bounds = array<i64: 16, 128>}, {transform_indices = @transform_1, window_bounds = array<i64: 16, 128>}, {transform_indices = @transform_2, window_bounds = array<i64: 16, 128>}, {transform_indices = @transform_3, window_bounds = array<i64: 16, 128>}]} {
    %c0_i32 = arith.constant 0 : i32
    %0 = arith.cmpi eq, %arg1, %c0_i32 : i32
    %1 = arith.extui %0 : i1 to i32
    %c0_i32_0 = arith.constant 0 : i32
    %2 = arith.cmpi ne, %1, %c0_i32_0 : i32
    scf.if %2 {
      %cst = arith.constant 0.000000e+00 : f32
      %15 = vector.broadcast %cst : f32 to vector<16x128xf32>
      %c0_9 = arith.constant 0 : index
      %c0_10 = arith.constant 0 : index
      %16 = vector.load %arg4[%c0_9, %c0_10] : memref<16x128xf32, #tpu.memory_space<vmem>>, vector<16x128xf32>
      tpu.vector_store %arg4[%c0_9, %c0_10], %15 {strides = array<i32>} : memref<16x128xf32, #tpu.memory_space<vmem>>, vector<16x128xf32>,
      %cst_11 = arith.constant 0.000000e+00 : f32
      %17 = vector.broadcast %cst_11 : f32 to vector<16x128xf32>
      %c0_12 = arith.constant 0 : index
      %c0_13 = arith.constant 0 : index
      %18 = vector.load %arg5[%c0_12, %c0_13] : memref<16x128xf32, #tpu.memory_space<vmem>>, vector<16x128xf32>
      tpu.vector_store %arg5[%c0_12, %c0_13], %17 {strides = array<i32>} : memref<16x128xf32, #tpu.memory_space<vmem>>, vector<16x128xf32>,
    } else {
    }
    %c0 = arith.constant 0 : index
    %c0_1 = arith.constant 0 : index
    %3 = vector.load %arg2[%c0, %c0_1] : memref<16x128xf32, #tpu.memory_space<vmem>>, vector<16x128xf32>
    %c0_2 = arith.constant 0 : index
    %c0_3 = arith.constant 0 : index
    %4 = vector.load %arg3[%c0_2, %c0_3] : memref<16x128xf32, #tpu.memory_space<vmem>>, vector<16x128xf32>
    %c1_i32 = arith.constant 1 : i32
    %5 = arith.muli %arg0, %c1_i32 : i32
    %6 = arith.addi %5, %arg1 : i32
    %c16_i32 = arith.constant 16 : i32
    %7 = arith.muli %6, %c16_i32 : i32
    %c16_i32_4 = arith.constant 16 : i32
    %8 = arith.subi %c16_i32_4, %7 : i32
    %c16_i32_5 = arith.constant 16 : i32
    %9 = arith.cmpi sge, %8, %c16_i32_5 : i32
    %10 = arith.extui %9 : i1 to i32
    %c0_i32_6 = arith.constant 0 : i32
    %11 = arith.cmpi ne, %10, %c0_i32_6 : i32
    scf.if %11 {
      %15 = arith.mulf %3, %4 : vector<16x128xf32>
      %16 = arith.addf %3, %4 : vector<16x128xf32>
      %c0_9 = arith.constant 0 : index
      %c0_10 = arith.constant 0 : index
      %17 = vector.load %arg4[%c0_9, %c0_10] : memref<16x128xf32, #tpu.memory_space<vmem>>, vector<16x128xf32>
      %18 = vector.shape_cast %15 : vector<16x128xf32> to vector<1x16x128xf32>
      %cst = arith.constant dense<0.000000e+00> : vector<16x128xf32>
      %19 = vector.multi_reduction <add>, %18, %cst [0] : vector<1x16x128xf32> to vector<16x128xf32>
      %20 = arith.addf %17, %19 : vector<16x128xf32>
      %c0_11 = arith.constant 0 : index
      %c0_12 = arith.constant 0 : index
      %21 = vector.load %arg4[%c0_11, %c0_12] : memref<16x128xf32, #tpu.memory_space<vmem>>, vector<16x128xf32>
      tpu.vector_store %arg4[%c0_11, %c0_12], %20 {strides = array<i32>} : memref<16x128xf32, #tpu.memory_space<vmem>>, vector<16x128xf32>,
      %c0_13 = arith.constant 0 : index
      %c0_14 = arith.constant 0 : index
      %22 = vector.load %arg5[%c0_13, %c0_14] : memref<16x128xf32, #tpu.memory_space<vmem>>, vector<16x128xf32>
      %23 = vector.shape_cast %16 : vector<16x128xf32> to vector<1x16x128xf32>
      %cst_15 = arith.constant dense<0.000000e+00> : vector<16x128xf32>
      %24 = vector.multi_reduction <add>, %23, %cst_15 [0] : vector<1x16x128xf32> to vector<16x128xf32>
      %25 = arith.addf %22, %24 : vector<16x128xf32>
      %c0_16 = arith.constant 0 : index
      %c0_17 = arith.constant 0 : index
      %26 = vector.load %arg5[%c0_16, %c0_17] : memref<16x128xf32, #tpu.memory_space<vmem>>, vector<16x128xf32>
      tpu.vector_store %arg5[%c0_16, %c0_17], %25 {strides = array<i32>} : memref<16x128xf32, #tpu.memory_space<vmem>>, vector<16x128xf32>,
    } else {
    }
    %c16_i32_7 = arith.constant 16 : i32
    %12 = arith.cmpi slt, %8, %c16_i32_7 : i32
    %13 = arith.extui %12 : i1 to i32
    %c0_i32_8 = arith.constant 0 : i32
    %14 = arith.cmpi ne, %13, %c0_i32_8 : i32
    scf.if %14 {
      %15 = tpu.iota {dimensions = array<i32: 0>} : vector<16x128xi32>
      %16 = vector.broadcast %8 : i32 to vector<16x128xi32>
      %17 = arith.cmpi slt, %15, %16 : vector<16x128xi32>
      %18 = arith.mulf %3, %4 : vector<16x128xf32>
      %cst = arith.constant 0.000000e+00 : f32
      %19 = vector.broadcast %cst : f32 to vector<16x128xf32>
      %20 = arith.select %17, %18, %19 : vector<16x128xi1>, vector<16x128xf32>
      %21 = arith.addf %3, %4 : vector<16x128xf32>
      %cst_9 = arith.constant 0.000000e+00 : f32
      %22 = vector.broadcast %cst_9 : f32 to vector<16x128xf32>
      %23 = arith.select %17, %21, %22 : vector<16x128xi1>, vector<16x128xf32>
      %c0_10 = arith.constant 0 : index
      %c0_11 = arith.constant 0 : index
      %24 = vector.load %arg4[%c0_10, %c0_11] : memref<16x128xf32, #tpu.memory_space<vmem>>, vector<16x128xf32>
      %25 = vector.shape_cast %20 : vector<16x128xf32> to vector<1x16x128xf32>
      %cst_12 = arith.constant dense<0.000000e+00> : vector<16x128xf32>
      %26 = vector.multi_reduction <add>, %25, %cst_12 [0] : vector<1x16x128xf32> to vector<16x128xf32>
      %27 = arith.addf %24, %26 : vector<16x128xf32>
      %c0_13 = arith.constant 0 : index
      %c0_14 = arith.constant 0 : index
      %28 = vector.load %arg4[%c0_13, %c0_14] : memref<16x128xf32, #tpu.memory_space<vmem>>, vector<16x128xf32>
      tpu.vector_store %arg4[%c0_13, %c0_14], %27 {strides = array<i32>} : memref<16x128xf32, #tpu.memory_space<vmem>>, vector<16x128xf32>,
      %c0_15 = arith.constant 0 : index
      %c0_16 = arith.constant 0 : index
      %29 = vector.load %arg5[%c0_15, %c0_16] : memref<16x128xf32, #tpu.memory_space<vmem>>, vector<16x128xf32>
      %30 = vector.shape_cast %23 : vector<16x128xf32> to vector<1x16x128xf32>
      %cst_17 = arith.constant dense<0.000000e+00> : vector<16x128xf32>
      %31 = vector.multi_reduction <add>, %30, %cst_17 [0] : vector<1x16x128xf32> to vector<16x128xf32>
      %32 = arith.addf %29, %31 : vector<16x128xf32>
      %c0_18 = arith.constant 0 : index
      %c0_19 = arith.constant 0 : index
      %33 = vector.load %arg5[%c0_18, %c0_19] : memref<16x128xf32, #tpu.memory_space<vmem>>, vector<16x128xf32>
      tpu.vector_store %arg5[%c0_18, %c0_19], %32 {strides = array<i32>} : memref<16x128xf32, #tpu.memory_space<vmem>>, vector<16x128xf32>,
    } else {
    }
    return
  }
  func.func @transform_0(%arg0: i32, %arg1: i32) -> (i32, i32) {
    %c1_i32 = arith.constant 1 : i32
    %0 = arith.muli %arg0, %c1_i32 : i32
    %1 = arith.addi %0, %arg1 : i32
    %c0_i32 = arith.constant 0 : i32
    %c0_i32_0 = arith.constant 0 : i32
    return %1, %c0_i32 : i32, i32
  }
  func.func @transform_1(%arg0: i32, %arg1: i32) -> (i32, i32) {
    %c1_i32 = arith.constant 1 : i32
    %0 = arith.muli %arg0, %c1_i32 : i32
    %1 = arith.addi %0, %arg1 : i32
    %c0_i32 = arith.constant 0 : i32
    %c0_i32_0 = arith.constant 0 : i32
    return %1, %c0_i32 : i32, i32
  }
  func.func @transform_2(%arg0: i32, %arg1: i32) -> (i32, i32) {
    %c0_i32 = arith.constant 0 : i32
    %c0_i32_0 = arith.constant 0 : i32
    return %arg0, %c0_i32 : i32, i32
  }
  func.func @transform_3(%arg0: i32, %arg1: i32) -> (i32, i32) {
    %c0_i32 = arith.constant 0 : i32
    %c0_i32_0 = arith.constant 0 : i32
    return %arg0, %c0_i32 : i32, i32
  }
}

</mosaic_0001>

<bundles_post_ra>
// kernel: tpu_custom_call.1
= control target key start
LH: loop header
LB: loop body
LE: loop exit
PB: predicated region body
PF: predicated region fallthrough
CT: control target
= control target key end

     0   :  { %9 = vsyncpa [#allocation3], 0  ;;  %s358_s0 = inlined_call_operand.hbm [shape: f32[16,128], index: 0, kind: input, shape index: {}]   ;;  %s359_s1 = inlined_call_operand.hbm [shape: f32[16,128], index: 1, kind: input, shape index: {}]   ;;  %s360_s2 = inlined_call_operand.hbm [shape: f32[16,128], index: 2, kind: output, shape index: {0}]   ;;  %s361_s3 = inlined_call_operand.hbm [shape: f32[16,128], index: 3, kind: output, shape index: {1}]  }
   0x1   :  { %10 = vsyncpa [#allocation6], 0 }
   0x2   :  { %11 = vsyncpa [#allocation4], 0 }
   0x3   :  { %12 = vsyncpa [#allocation9], 0  ;;  %s265_s12 = smov [#allocation2]   ;;  %s169_s16 = scalar_lea.hbm %s358_s0, 256 }
   0x4   :  { %s22_s13 = sshll.u32 %s265_s12, 4  ;;  %p170_p0 = scmp.ne.s32.totalorder %s358_s0, %s169_s16  ;;  %s23_s13 = int_to_ptr.vmem [resolvable:$true] %s22_s13 }
   0x5   :  { %p173_p1 = scmp.lt.u32.totalorder %s169_s16, %s358_s0 }
   0x7   :  { %p175_p2 = pnand %p173_p1, %p170_p0 }
   0x9   :  { %178 = shalt.err (!%p175_p2)
}
   0xa   :  { %s179_s21 = scalar_lea.vmem %s23_s13, 256  ;;  %p184_p4 = scmp.lt.s32.totalorder %s23_s13, %s23_s13 }
   0xb   :  { %p180_p3 = scmp.ne.s32.totalorder %s23_s13, %s179_s21  ;;  %p185_p5 = scmp.lt.s32.totalorder %s179_s21, %s179_s21 }
   0xd   :  { %p186_p6 = por %p185_p5, %p184_p4 }
   0xf   :  { %p187_p7 = pnand %p186_p6, %p180_p3 }
  0x11   :  { %190 = shalt.err (!%p187_p7)
}
  0x12   :  { %s266_s22 = smov 128   ;;  %s267_s23 = smov 8  }
  0x13   :  { %28 = dma.hbm_to_vmem [thread:$0]  %s358_s0, 256, %s23_s13, [#allocation3], %s266_s22, %s266_s22, %s267_s23  }
  0x14   :  { %s268_s26 = smov [#allocation5]   ;;  %s191_s30 = scalar_lea.hbm %s359_s1, 256 }
  0x15   :  { %s38_s27 = sshll.u32 %s268_s26, 4  ;;  %p192_p8 = scmp.ne.s32.totalorder %s359_s1, %s191_s30  ;;  %s39_s27 = int_to_ptr.vmem [resolvable:$true] %s38_s27 }
  0x16   :  { %p195_p9 = scmp.lt.u32.totalorder %s191_s30, %s359_s1 }
  0x18   :  { %p197_p10 = pnand %p195_p9, %p192_p8 }
  0x1a   :  { %200 = shalt.err (!%p197_p10)
}
  0x1b   :  { %s201_s8 = scalar_lea.vmem %s39_s27, 256  ;;  %p206_p12 = scmp.lt.s32.totalorder %s39_s27, %s39_s27 }
  0x1c   :  { %p202_p11 = scmp.ne.s32.totalorder %s39_s27, %s201_s8  ;;  %p207_p13 = scmp.lt.s32.totalorder %s201_s8, %s201_s8 }
  0x1e   :  { %p208_p0 = por %p207_p13, %p206_p12 }
  0x20   :  { %p209_p1 = pnand %p208_p0, %p202_p11 }
  0x22   :  { %212 = shalt.err (!%p209_p1)
}
  0x23   :  { %44 = dma.hbm_to_vmem [thread:$0]  %s359_s1, 256, %s39_s27, [#allocation6], %s266_s22, %s266_s22, %s267_s23  }
  0x24   :  { %257 = dma.done.wait [#allocation3], 256  }
  0x25   :  { %258 = vsyncadd [#allocation3], 4294967040 }
  0x26   :  { %259 = dma.done.wait [#allocation6], 256  }
  0x27   :  { %260 = vsyncadd [#allocation6], 4294967040  ;;  %v63_v0 = vld [vmem:[#allocation2] sm:$0xff]  ;;  %v65_v1 = vld [vmem:[#allocation5] sm:$0xff]  ;;  %s269_s10 = smov [#allocation7]   ;;  %s270_s12 = smov [#allocation8]  }
  0x28   :  { %v64_v2 = vld [vmem:[#allocation2 + $0x8] sm:$0xff]  ;;  %v74_v3 = vmul.f32 %v65_v1, %v63_v0  ;;  %v66_v4 = vld [vmem:[#allocation5 + $0x8] sm:$0xff]  ;;  %v76_v5 = vadd.f32 %v65_v1, %v63_v0  ;;  %s133_s11 = sshll.u32 %s269_s10, 4  ;;  %s145_s13 = sshll.u32 %s270_s12, 4  ;;  %s134_s11 = int_to_ptr.vmem [resolvable:$true] %s133_s11  ;;  %s321_s13 = int_to_ptr.vmem [resolvable:$true] %s145_s13 }
  0x29   :  { %v75_v6 = vmul.f32 %v66_v4, %v64_v2  ;;  %v77_v7 = vadd.f32 %v66_v4, %v64_v2  ;;  %s213_s1 = scalar_lea.vmem %s134_s11, 256  ;;  %p218_p3 = scmp.lt.s32.totalorder %s134_s11, %s134_s11 }
  0x2a   :  { %84 = vst [vmem:[#allocation7] sm:$0xff] %v74_v3  ;;  %92 = vst [vmem:[#allocation8] sm:$0xff] %v76_v5  ;;  %p214_p2 = scmp.ne.s32.totalorder %s134_s11, %s213_s1  ;;  %p219_p4 = scmp.lt.s32.totalorder %s213_s1, %s213_s1 }
  0x2b   :  { %85 = vst [vmem:[#allocation7 + $0x8] sm:$0xff] %v75_v6  ;;  %93 = vst [vmem:[#allocation8 + $0x8] sm:$0xff] %v77_v7 }
  0x2c   :  { %p220_p5 = por %p219_p4, %p218_p3 }
  0x2e   :  { %p221_p6 = pnand %p220_p5, %p214_p2 }
  0x30   :  { %224 = shalt.err (!%p221_p6)
}
  0x31   :  { %s225_s16 = scalar_lea.hbm %s360_s2, 256 }
  0x32   :  { %p226_p7 = scmp.ne.s32.totalorder %s360_s2, %s225_s16  ;;  %p229_p8 = scmp.lt.u32.totalorder %s225_s16, %s360_s2 }
  0x34   :  { %p231_p9 = pnand %p229_p8, %p226_p7 }
  0x36   :  { %234 = shalt.err (!%p231_p9)
}
  0x37   :  { %139 = dma.vmem_to_hbm [thread:$0]  %s134_s11, 256, %s360_s2, [#allocation4], %s266_s22, %s266_s22, %s267_s23  }
  0x38   :  { %s235_s25 = scalar_lea.vmem %s321_s13, 256  ;;  %p240_p11 = scmp.lt.s32.totalorder %s321_s13, %s321_s13 }
  0x39   :  { %p236_p10 = scmp.ne.s32.totalorder %s321_s13, %s235_s25  ;;  %p241_p12 = scmp.lt.s32.totalorder %s235_s25, %s235_s25 }
  0x3b   :  { %p242_p13 = por %p241_p12, %p240_p11 }
  0x3d   :  { %p243_p0 = pnand %p242_p13, %p236_p10 }
  0x3f   :  { %246 = shalt.err (!%p243_p0)
}
  0x40   :  { %s247_s28 = scalar_lea.hbm %s361_s3, 256 }
  0x41   :  { %p248_p1 = scmp.ne.s32.totalorder %s361_s3, %s247_s28  ;;  %p251_p2 = scmp.lt.u32.totalorder %s247_s28, %s361_s3 }
  0x43   :  { %p253_p3 = pnand %p251_p2, %p248_p1 }
  0x45   :  { %256 = shalt.err (!%p253_p3)
}
  0x46   :  { %151 = dma.vmem_to_hbm [thread:$0]  %s321_s13, 256, %s361_s3, [#allocation9], %s266_s22, %s266_s22, %s267_s23  }
  0x47   :  { %261 = dma.done.wait [#allocation4], 256  }
  0x48   :  { %262 = vsyncadd [#allocation4], 4294967040 }
  0x49   :  { %263 = dma.done.wait [#allocation9], 256  }
  0x4a   :  { %264 = vsyncadd [#allocation9], 4294967040 }
  0x4b   :  { %158 = vsyncpa [#allocation3], 1 }
  0x4c   :  { %159 = vsyncpa [#allocation6], 1 }
  0x4d   :  { %160 = vsyncpa [#allocation4], 1 }
  0x4e   :  { %161 = vsyncpa [#allocation9], 1 }

</bundles_post_ra>
